<compile_context>
chip_gen: v7x
topology: tpu7x:2x2x1
jax: 0.10.0
libtpu: 0.0.40
codegen_flags: <defaults>
</compile_context>

<pallas_src>
import jax
import jax.numpy as jnp
from jax.experimental import pallas as pl
from jax.experimental.pallas import tpu as pltpu


# ----------------------------------------------------------------------------
# Kernel: one batch tile of   out = relu(x @ W1 + b1) @ W2 + b2
# ----------------------------------------------------------------------------
def mlp_kernel(x_ref, w1_ref, b1_ref, w2_ref, b2_ref, o_ref):
    # hidden = relu(x @ W1 + b1) -- MXU matmul, f32 accumulation; bias-add and
    # ReLU stay in f32 (also correct on v5e, whose VPU has no bf16).
    h = jnp.dot(x_ref[...], w1_ref[...], preferred_element_type=jnp.float32)
    h = jnp.maximum(h + b1_ref[...], 0.0)
    # out = h @ W2 + b2   (hidden re-cast to the matmul dtype for the MXU).
    out = jnp.dot(h.astype(w2_ref.dtype), w2_ref[...],
                  preferred_element_type=jnp.float32)
    o_ref[...] = (out + b2_ref[...]).astype(o_ref.dtype)


def _round_up(n, m):
    return ((n + m - 1) // m) * m


# ----------------------------------------------------------------------------
# One-time parameter preparation (hoisted out of the per-call path).
# ----------------------------------------------------------------------------
def prepare_params(w1, b1, w2, b2, *, use_bf16_matmul=True, lane_align=128):
    """Pad ONLY the hidden (lane) dim of W1/b1/W2 and cast matmul operands.

    Zero padding is mathematically exact (relu(0 + 0) = 0 and the padded rows
    of W2 are zero).  K (features) and N (outputs) are NOT padded: their
    blocks use the full array dims and Mosaic pads the contraction in-vreg,
    so the streamed x / out arrays carry no wasted HBM bytes.

    use_bf16_matmul: bf16 MXU inputs with f32 accumulation (default; MXU is
        bf16-native on v5e/v6e/v7x and it halves x/weight DMA bytes).
    lane_align: 128 by default; use 256 for non-tiny hidden layers on
        v6e/v7x (2x256x256 MXU tiles).  Biases stay f32.
    """
    K, H = w1.shape
    H2, N = w2.shape
    assert H == H2 and b1.shape == (1, H) and b2.shape == (1, N)
    Hp = _round_up(H, lane_align)
    mm_dtype = jnp.bfloat16 if use_bf16_matmul else jnp.float32
    w1_p = jnp.pad(w1.astype(jnp.float32), ((0, 0), (0, Hp - H))).astype(mm_dtype)
    b1_p = jnp.pad(b1.astype(jnp.float32), ((0, 0), (0, Hp - H)))
    w2_p = jnp.pad(w2.astype(jnp.float32), ((0, Hp - H), (0, 0))).astype(mm_dtype)
    b2_p = b2.astype(jnp.float32)
    return w1_p, b1_p, w2_p, b2_p


# ----------------------------------------------------------------------------
# Forward wrapper (jitted below).
# ----------------------------------------------------------------------------
def net_forward(x, params, *, block_b=512, out_dtype=jnp.float32,
                single_buffer_weights=True):
    """Pallas equivalent of Net.forward:  relu(x @ W1 + b1) @ W2 + b2.

    x      : (B, n_feature)
    params : output of prepare_params() -- weights already padded/cast once,
             reused across every call.
    block_b: batch tile size (rounded to the sublane multiple).  512 keeps the
             x/out streaming pipeline near HBM roofline while staying far
             below per-core VMEM limits at these layer sizes.
    out_dtype: set jnp.bfloat16 to halve output writeback bytes (helps v5e's
             single store slot most) if the consumer accepts it.
    single_buffer_weights: constant-index weight/bias blocks get one pipeline
             buffer instead of two (their block index never changes).
    """
    w1_p, b1_p, w2_p, b2_p = params
    B, K = x.shape
    Kw, Hp = w1_p.shape
    Hw, N = w2_p.shape
    assert K == Kw and Hp == Hw and b1_p.shape == (1, Hp) and b2_p.shape == (1, N)

    mm_dtype = w1_p.dtype
    x_mm = x.astype(mm_dtype)          # fused under jit; no padding, no extra pass

    # Batch tile: multiple of the sublane packing (8 f32 / 16 bf16 rows),
    # never larger than the 8-aligned batch.  Grid uses cdiv on the UNPADDED
    # batch; the partial last block is masked by Pallas (rows independent).
    sub = 16 if mm_dtype == jnp.bfloat16 else 8
    tb = min(_round_up(block_b, sub), _round_up(B, 8))
    grid = (pl.cdiv(B, tb),)

    # Per-TensorCore VMEM budget (v5e scoped default 16 MiB, v7x physical
    # 64 MiB per core).  Only override the scoped default when needed.
    mm_bytes = 2 if mm_dtype == jnp.bfloat16 else 4
    out_bytes = jnp.dtype(out_dtype).itemsize
    n_wbuf = 1 if single_buffer_weights else 2
    vmem_est = (2 * tb * K * mm_bytes                    # double-buffered x tiles
                + 2 * tb * N * out_bytes                 # double-buffered out tiles
                + n_wbuf * (K * Hp + Hp * N) * mm_bytes  # resident weights
                + n_wbuf * (Hp + N) * 4                  # resident biases (f32)
                + tb * Hp * 4)                           # f32 hidden intermediate
    vmem_limit_bytes = None
    if vmem_est > 12 * 1024 * 1024:
        vmem_limit_bytes = min(int(vmem_est * 3 // 2), 64 * 1024 * 1024)

    def const_spec(shape):
        # Constant block index -> VMEM-resident across the whole grid; a second
        # pipeline buffer would be pure VMEM waste.
        if single_buffer_weights:
            return pl.BlockSpec(shape, lambda i: (0, 0),
                                pipeline_mode=pl.Buffered(1))
        return pl.BlockSpec(shape, lambda i: (0, 0))

    return pl.pallas_call(
        mlp_kernel,
        out_shape=jax.ShapeDtypeStruct((B, N), out_dtype),
        grid=grid,
        in_specs=[
            # x tiles stream over the batch axis (double-buffered DMA);
            # K block == full array dim -> no feature-axis padding in HBM.
            pl.BlockSpec((tb, K), lambda i: (i, 0)),
            const_spec((K, Hp)),     # W1 (hidden lane dim padded once, at init)
            const_spec((1, Hp)),     # b1
            const_spec((Hp, N)),     # W2
            const_spec((1, N)),      # b2
        ],
        # N block == full array dim: for tiny n_output, the 64x HBM writeback
        # inflation of lane-padding outweighs the masked-vst penalty.
        out_specs=pl.BlockSpec((tb, N), lambda i: (i, 0)),
        compiler_params=pltpu.CompilerParams(
            # Independent batch tiles: v7x shards them across its two
            # TensorCores (no-op on single-core v5e/v6e).
            dimension_semantics=("parallel",),
            vmem_limit_bytes=vmem_limit_bytes,
        ),
    )(x_mm, w1_p, b1_p, w2_p, b2_p)


forward = jax.jit(
    net_forward,
    static_argnames=("block_b", "out_dtype", "single_buffer_weights"))


def init_linear(key, fan_in, fan_out):
    """Deterministic PyTorch-style Linear init: U(-1/sqrt(fan_in), +1/sqrt(fan_in))."""
    kw, kb = jax.random.split(key)
    bound = 1.0 / jnp.sqrt(float(fan_in))
    w = jax.random.uniform(kw, (fan_in, fan_out), jnp.float32, -bound, bound)
    b = jax.random.uniform(kb, (1, fan_out), jnp.float32, -bound, bound)
    return w, b


if __name__ == "__main__":
    key = jax.random.PRNGKey(0)
    k_x, k_h, k_p, k_x2 = jax.random.split(key, 4)

    batch, n_feature, n_hidden, n_output = 8, 4, 32, 2

    x = jax.random.normal(k_x, (batch, n_feature), jnp.float32)
    w1, b1 = init_linear(k_h, n_feature, n_hidden)   # self.hidden
    w2, b2 = init_linear(k_p, n_hidden, n_output)    # self.predict

    ref = jnp.maximum(x @ w1 + b1, 0.0) @ w2 + b2

    # --- exact-precision path: f32 matmuls, params prepared once ------------
    params_f32 = prepare_params(w1, b1, w2, b2, use_bf16_matmul=False)

    sbw = True
    try:
        out = forward(x, params_f32, single_buffer_weights=sbw)
        jax.block_until_ready(out)
    except Exception:
        # If this jax build rejects pipeline_mode=pl.Buffered(1), fall back to
        # default (double-buffered) weight blocks -- functionally identical.
        sbw = False
        out = forward(x, params_f32, single_buffer_weights=sbw)
        jax.block_until_ready(out)

    assert out.shape == (batch, n_output)
    assert jnp.allclose(out, ref, atol=1e-5, rtol=1e-5)

    # --- multi-tile grid + masked partial last block -------------------------
    batch2 = 33                      # not a multiple of the 8-row tile
    x2 = jax.random.normal(k_x2, (batch2, n_feature), jnp.float32)
    out2 = forward(x2, params_f32, block_b=8, single_buffer_weights=sbw)
    jax.block_until_ready(out2)
    ref2 = jnp.maximum(x2 @ w1 + b1, 0.0) @ w2 + b2
    assert out2.shape == (batch2, n_output)
    assert jnp.allclose(out2, ref2, atol=1e-5, rtol=1e-5)

    # --- default (performance) path: bf16 MXU inputs, f32 accumulation ------
    params_bf16 = prepare_params(w1, b1, w2, b2)     # bf16 by default
    out_bf16 = forward(x, params_bf16, single_buffer_weights=sbw)
    jax.block_until_ready(out_bf16)
    assert out_bf16.shape == (batch, n_output)
    assert jnp.allclose(out_bf16, ref, atol=2e-2, rtol=2e-2)

    print("KERNEL_OK")
</pallas_src>

<mosaic_0001>
module attributes {stable_mosaic.version = 11 : i64} {
  func.func @mlp_kernel(%arg0: i32, %arg1: memref<8x4xf32, #tpu.memory_space<vmem>>, %arg2: memref<4x128xf32, #tpu.memory_space<vmem>>, %arg3: memref<1x128xf32, #tpu.memory_space<vmem>>, %arg4: memref<128x2xf32, #tpu.memory_space<vmem>>, %arg5: memref<1x2xf32, #tpu.memory_space<vmem>>, %arg6: memref<8x2xf32, #tpu.memory_space<vmem>>) attributes {dimension_semantics = [#tpu.dimension_semantics<parallel>], iteration_bounds = array<i64: 1>, scalar_prefetch = 0 : i64, scratch_operands = 0 : i64, tpu.core_type = #tpu.core_type<tc>, window_params = [{transform_indices = @transform_0, window_bounds = array<i64: 8, 4>}, {pipeline_mode = #tpu.pipeline_mode<synchronous>, transform_indices = @transform_1, window_bounds = array<i64: 4, 128>}, {pipeline_mode = #tpu.pipeline_mode<synchronous>, transform_indices = @transform_2, window_bounds = array<i64: 1, 128>}, {pipeline_mode = #tpu.pipeline_mode<synchronous>, transform_indices = @transform_3, window_bounds = array<i64: 128, 2>}, {pipeline_mode = #tpu.pipeline_mode<synchronous>, transform_indices = @transform_4, window_bounds = array<i64: 1, 2>}, {transform_indices = @transform_5, window_bounds = array<i64: 8, 2>}]} {
    %c0 = arith.constant 0 : index
    %c0_0 = arith.constant 0 : index
    %0 = vector.load %arg1[%c0, %c0_0] : memref<8x4xf32, #tpu.memory_space<vmem>>, vector<8x4xf32>
    %c0_1 = arith.constant 0 : index
    %c0_2 = arith.constant 0 : index
    %1 = vector.load %arg2[%c0_1, %c0_2] : memref<4x128xf32, #tpu.memory_space<vmem>>, vector<4x128xf32>
    %cst = arith.constant dense<0.000000e+00> : vector<8x128xf32>
    %2 = tpu.matmul %0, %1, %cst {dimension_numbers = #tpu.dot_dimension_numbers<[1], [0], [0], [1], [0, 0, 1, 1], [], []>} : vector<8x4xf32>, vector<4x128xf32>, vector<8x128xf32> -> vector<8x128xf32>
    %c0_3 = arith.constant 0 : index
    %c0_4 = arith.constant 0 : index
    %3 = vector.load %arg3[%c0_3, %c0_4] : memref<1x128xf32, #tpu.memory_space<vmem>>, vector<1x128xf32>
    %4 = vector.broadcast %3 : vector<1x128xf32> to vector<8x128xf32>
    %5 = arith.addf %2, %4 : vector<8x128xf32>
    %cst_5 = arith.constant 0.000000e+00 : f32
    %6 = vector.broadcast %cst_5 : f32 to vector<8x128xf32>
    %7 = arith.maximumf %5, %6 : vector<8x128xf32>
    %c0_6 = arith.constant 0 : index
    %c0_7 = arith.constant 0 : index
    %8 = vector.load %arg4[%c0_6, %c0_7] : memref<128x2xf32, #tpu.memory_space<vmem>>, vector<128x2xf32>
    %cst_8 = arith.constant dense<0.000000e+00> : vector<8x2xf32>
    %9 = tpu.matmul %7, %8, %cst_8 {dimension_numbers = #tpu.dot_dimension_numbers<[1], [0], [0], [1], [0, 0, 1, 1], [], []>} : vector<8x128xf32>, vector<128x2xf32>, vector<8x2xf32> -> vector<8x2xf32>
    %c0_9 = arith.constant 0 : index
    %c0_10 = arith.constant 0 : index
    %10 = vector.load %arg5[%c0_9, %c0_10] : memref<1x2xf32, #tpu.memory_space<vmem>>, vector<1x2xf32>
    %11 = vector.broadcast %10 : vector<1x2xf32> to vector<8x2xf32>
    %12 = arith.addf %9, %11 : vector<8x2xf32>
    %c0_11 = arith.constant 0 : index
    %c0_12 = arith.constant 0 : index
    %13 = vector.load %arg6[%c0_11, %c0_12] : memref<8x2xf32, #tpu.memory_space<vmem>>, vector<8x2xf32>
    tpu.vector_store %arg6[%c0_11, %c0_12], %12 {strides = array<i32>} : memref<8x2xf32, #tpu.memory_space<vmem>>, vector<8x2xf32>,
    return
  }
  func.func @transform_0(%arg0: i32) -> (i32, i32) {
    %c0_i32 = arith.constant 0 : i32
    %c0_i32_0 = arith.constant 0 : i32
    return %arg0, %c0_i32 : i32, i32
  }
  func.func @transform_1(%arg0: i32) -> (i32, i32) {
    %c0_i32 = arith.constant 0 : i32
    %c0_i32_0 = arith.constant 0 : i32
    %c0_i32_1 = arith.constant 0 : i32
    return %c0_i32, %c0_i32_0 : i32, i32
  }
  func.func @transform_2(%arg0: i32) -> (i32, i32) {
    %c0_i32 = arith.constant 0 : i32
    %c0_i32_0 = arith.constant 0 : i32
    %c0_i32_1 = arith.constant 0 : i32
    return %c0_i32, %c0_i32_0 : i32, i32
  }
  func.func @transform_3(%arg0: i32) -> (i32, i32) {
    %c0_i32 = arith.constant 0 : i32
    %c0_i32_0 = arith.constant 0 : i32
    %c0_i32_1 = arith.constant 0 : i32
    return %c0_i32, %c0_i32_0 : i32, i32
  }
  func.func @transform_4(%arg0: i32) -> (i32, i32) {
    %c0_i32 = arith.constant 0 : i32
    %c0_i32_0 = arith.constant 0 : i32
    %c0_i32_1 = arith.constant 0 : i32
    return %c0_i32, %c0_i32_0 : i32, i32
  }
  func.func @transform_5(%arg0: i32) -> (i32, i32) {
    %c0_i32 = arith.constant 0 : i32
    %c0_i32_0 = arith.constant 0 : i32
    return %arg0, %c0_i32 : i32, i32
  }
}

module attributes {stable_mosaic.version = 11 : i64} {
  func.func @mlp_kernel(%arg0: i32, %arg1: memref<8x4xf32, #tpu.memory_space<vmem>>, %arg2: memref<4x128xf32, #tpu.memory_space<vmem>>, %arg3: memref<1x128xf32, #tpu.memory_space<vmem>>, %arg4: memref<128x2xf32, #tpu.memory_space<vmem>>, %arg5: memref<1x2xf32, #tpu.memory_space<vmem>>, %arg6: memref<8x2xf32, #tpu.memory_space<vmem>>) attributes {dimension_semantics = [#tpu.dimension_semantics<parallel>], iteration_bounds = array<i64: 1>, scalar_prefetch = 0 : i64, scratch_operands = 0 : i64, tpu.core_type = #tpu.core_type<tc>, window_params = [{transform_indices = @transform_0, window_bounds = array<i64: 8, 4>}, {pipeline_mode = #tpu.pipeline_mode<synchronous>, transform_indices = @transform_1, window_bounds = array<i64: 4, 128>}, {pipeline_mode = #tpu.pipeline_mode<synchronous>, transform_indices = @transform_2, window_bounds = array<i64: 1, 128>}, {pipeline_mode = #tpu.pipeline_mode<synchronous>, transform_indices = @transform_3, window_bounds = array<i64: 128, 2>}, {pipeline_mode = #tpu.pipeline_mode<synchronous>, transform_indices = @transform_4, window_bounds = array<i64: 1, 2>}, {transform_indices = @transform_5, window_bounds = array<i64: 8, 2>}]} {
    %c0 = arith.constant 0 : index
    %c0_0 = arith.constant 0 : index
    %0 = vector.load %arg1[%c0, %c0_0] : memref<8x4xf32, #tpu.memory_space<vmem>>, vector<8x4xf32>
    %c0_1 = arith.constant 0 : index
    %c0_2 = arith.constant 0 : index
    %1 = vector.load %arg2[%c0_1, %c0_2] : memref<4x128xf32, #tpu.memory_space<vmem>>, vector<4x128xf32>
    %cst = arith.constant dense<0.000000e+00> : vector<8x128xf32>
    %2 = tpu.matmul %0, %1, %cst {dimension_numbers = #tpu.dot_dimension_numbers<[1], [0], [0], [1], [0, 0, 1, 1], [], []>} : vector<8x4xf32>, vector<4x128xf32>, vector<8x128xf32> -> vector<8x128xf32>
    %c0_3 = arith.constant 0 : index
    %c0_4 = arith.constant 0 : index
    %3 = vector.load %arg3[%c0_3, %c0_4] : memref<1x128xf32, #tpu.memory_space<vmem>>, vector<1x128xf32>
    %4 = vector.broadcast %3 : vector<1x128xf32> to vector<8x128xf32>
    %5 = arith.addf %2, %4 : vector<8x128xf32>
    %cst_5 = arith.constant 0.000000e+00 : f32
    %6 = vector.broadcast %cst_5 : f32 to vector<8x128xf32>
    %7 = arith.maximumf %5, %6 : vector<8x128xf32>
    %c0_6 = arith.constant 0 : index
    %c0_7 = arith.constant 0 : index
    %8 = vector.load %arg4[%c0_6, %c0_7] : memref<128x2xf32, #tpu.memory_space<vmem>>, vector<128x2xf32>
    %cst_8 = arith.constant dense<0.000000e+00> : vector<8x2xf32>
    %9 = tpu.matmul %7, %8, %cst_8 {dimension_numbers = #tpu.dot_dimension_numbers<[1], [0], [0], [1], [0, 0, 1, 1], [], []>} : vector<8x128xf32>, vector<128x2xf32>, vector<8x2xf32> -> vector<8x2xf32>
    %c0_9 = arith.constant 0 : index
    %c0_10 = arith.constant 0 : index
    %10 = vector.load %arg5[%c0_9, %c0_10] : memref<1x2xf32, #tpu.memory_space<vmem>>, vector<1x2xf32>
    %11 = vector.broadcast %10 : vector<1x2xf32> to vector<8x2xf32>
    %12 = arith.addf %9, %11 : vector<8x2xf32>
    %c0_11 = arith.constant 0 : index
    %c0_12 = arith.constant 0 : index
    %13 = vector.load %arg6[%c0_11, %c0_12] : memref<8x2xf32, #tpu.memory_space<vmem>>, vector<8x2xf32>
    tpu.vector_store %arg6[%c0_11, %c0_12], %12 {strides = array<i32>} : memref<8x2xf32, #tpu.memory_space<vmem>>, vector<8x2xf32>,
    return
  }
  func.func @transform_0(%arg0: i32) -> (i32, i32) {
    %c0_i32 = arith.constant 0 : i32
    %c0_i32_0 = arith.constant 0 : i32
    return %arg0, %c0_i32 : i32, i32
  }
  func.func @transform_1(%arg0: i32) -> (i32, i32) {
    %c0_i32 = arith.constant 0 : i32
    %c0_i32_0 = arith.constant 0 : i32
    %c0_i32_1 = arith.constant 0 : i32
    return %c0_i32, %c0_i32_0 : i32, i32
  }
  func.func @transform_2(%arg0: i32) -> (i32, i32) {
    %c0_i32 = arith.constant 0 : i32
    %c0_i32_0 = arith.constant 0 : i32
    %c0_i32_1 = arith.constant 0 : i32
    return %c0_i32, %c0_i32_0 : i32, i32
  }
  func.func @transform_3(%arg0: i32) -> (i32, i32) {
    %c0_i32 = arith.constant 0 : i32
    %c0_i32_0 = arith.constant 0 : i32
    %c0_i32_1 = arith.constant 0 : i32
    return %c0_i32, %c0_i32_0 : i32, i32
  }
  func.func @transform_4(%arg0: i32) -> (i32, i32) {
    %c0_i32 = arith.constant 0 : i32
    %c0_i32_0 = arith.constant 0 : i32
    %c0_i32_1 = arith.constant 0 : i32
    return %c0_i32, %c0_i32_0 : i32, i32
  }
  func.func @transform_5(%arg0: i32) -> (i32, i32) {
    %c0_i32 = arith.constant 0 : i32
    %c0_i32_0 = arith.constant 0 : i32
    return %arg0, %c0_i32 : i32, i32
  }
}

</mosaic_0001>

<bundles_post_ra>
// kernel: net_forward.1
= control target key start
LH: loop header
LB: loop body
LE: loop exit
PB: predicated region body
PF: predicated region fallthrough
CT: control target
= control target key end

     0   :  { %vm33_vm0 = vcmask 1043456   ;;  %vm29_vm1 = vcmask 31744   ;;  %v297_v0 = vmov 0.0   ;;  %vm298_vm2 = vmmov 0   ;;  %s393_s1 = inlined_call_operand.vmem [shape: f32[4,128], index: 1, kind: input, shape index: {}]   ;;  %s394_s0 = inlined_call_operand.vmem [shape: f32[8,4], index: 0, kind: input, shape index: {}]   ;;  %s395_s3 = inlined_call_operand.vmem [shape: f32[128,2], index: 3, kind: input, shape index: {}]   ;;  %s396_s2 = inlined_call_operand.vmem [shape: f32[1,128], index: 2, kind: input, shape index: {}]   ;;  %s397_s4 = inlined_call_operand.vmem [shape: f32[1,2], index: 4, kind: input, shape index: {}]   ;;  %s398_s5 = inlined_call_operand.vmem [shape: f32[8,2], index: 5, kind: output, shape index: {}]  }
   0x1   :  { %230 = vmatprep.subr.mxu0 %v297_v0  ;;  %v21_v1 = vld [vmem:[%s393_s1] sm:$0xf]  ;;  %232 = vmatprep.mubr.msk.f32.mxu0 %vm298_vm2, %v297_v0  ;;  %v299_v4 = vmov 0.0|0.0   ;;  %v109_v5 = vld [vmem:[%s395_s3 + $0x8] sm:$0xff]  ;;  %v110_v6 = vld [vmem:[%s395_s3 + $0x10] sm:$0xff]  ;;  %vm201_vm3 = vcmask 15360  }
   0x2   :  { %v20_v2 = vld [vmem:[%s394_s0] sm:$0xff]  ;;  %231 = vmatpush3.msk.msra.mxu0 %vm33_vm0, %v21_v1  ;;  %270 = vmatprep.subr.bf16.mxu1 %v299_v4  ;;  %v111_v7 = vld [vmem:[%s395_s3 + $0x18] sm:$0xff]  ;;  %v113_v11 = vld [vmem:[%s395_s3 + $0x28] sm:$0xff] }
   0x3   :  { %v108_v3 = vld [vmem:[%s395_s3] sm:$0xff]  ;;  %233 = vmatmul.mubr.msk.f32.vlgmr.msra.gmra.mrb[0].mxu0 %vm29_vm1, %v20_v2  ;;  %267 = vmatprep.mubr.msk.f32.mxu1 %vm298_vm2, %v297_v0  ;;  %v274_v9 = vpack.c.bf16 %v111_v7, %v110_v6  ;;  %v114_v13 = vld [vmem:[%s395_s3 + $0x30] sm:$0xff]  ;;  %v115_v14 = vld [vmem:[%s395_s3 + $0x38] sm:$0xff] }
   0x4   :  { %v271_v8 = vpack.c.bf16 %v109_v5, %v108_v3  ;;  %v112_v10 = vld [vmem:[%s395_s3 + $0x20] sm:$0xff]  ;;  %v280_v15 = vpack.c.bf16 %v115_v14, %v114_v13  ;;  %v117_v17 = vld [vmem:[%s395_s3 + $0x48] sm:$0xff]  ;;  %v118_v19 = vld [vmem:[%s395_s3 + $0x50] sm:$0xff] }
   0x5   :  { %v277_v12 = vpack.c.bf16 %v113_v11, %v112_v10  ;;  %v116_v16 = vld [vmem:[%s395_s3 + $0x40] sm:$0xff]  ;;  %v119_v20 = vld [vmem:[%s395_s3 + $0x58] sm:$0xff]  ;;  %v121_v23 = vld [vmem:[%s395_s3 + $0x68] sm:$0xff] }
   0x6   :  { %272 = vmatpush3.bf16.msra.mxu1 %v271_v8  ;;  %v283_v18 = vpack.c.bf16 %v117_v17, %v116_v16  ;;  %v286_v21 = vpack.c.bf16 %v119_v20, %v118_v19  ;;  %v120_v22 = vld [vmem:[%s395_s3 + $0x60] sm:$0xff]  ;;  %v122_v25 = vld [vmem:[%s395_s3 + $0x70] sm:$0xff]  ;;  %v123_v26 = vld [vmem:[%s395_s3 + $0x78] sm:$0xff] }
   0x7   :  { %273 = vmatprep.subr.bf16.mxu1 %v299_v4  ;;  %v289_v24 = vpack.c.bf16 %v121_v23, %v120_v22  ;;  %v292_v27 = vpack.c.bf16 %v123_v26, %v122_v25  ;;  %v207_v28 = vld [vmem:[%s396_s2] ss:$0 sm:$0xff] }
   0x8   :  { %v210_v33 = vld [vmem:[%s397_s4] ss:$0 sm:$0xff] }
   0xa   :  { %275 = vmatpush3.bf16.msra.mxu1 %v274_v9 }
   0xb   :  { %276 = vmatprep.subr.bf16.mxu1 %v299_v4 }
   0xe   :  { %278 = vmatpush3.bf16.msra.mxu1 %v277_v12 }
   0xf   :  { %279 = vmatprep.subr.bf16.mxu1 %v299_v4 }
  0x12   :  { %281 = vmatpush3.bf16.msra.mxu1 %v280_v15 }
  0x13   :  { %282 = vmatprep.subr.bf16.mxu1 %v299_v4 }
  0x16   :  { %284 = vmatpush3.bf16.msra.mxu1 %v283_v18 }
  0x17   :  { %285 = vmatprep.subr.bf16.mxu1 %v299_v4 }
  0x1a   :  { %287 = vmatpush3.bf16.msra.mxu1 %v286_v21 }
  0x1b   :  { %288 = vmatprep.subr.bf16.mxu1 %v299_v4 }
  0x1e   :  { %290 = vmatpush3.bf16.msra.mxu1 %v289_v24 }
  0x1f   :  { %291 = vmatprep.subr.bf16.mxu1 %v299_v4 }
  0x22   :  { %293 = vmatpush3.bf16.msra.mxu1 %v292_v27 }
  0xd6   :  { %v103_v29 = vpop.f32.mrb[0].mxu0 }
  0xd7   :  { %v104_v30 = vadd.f32 %v207_v28, %v103_v29  ;;  %v234_v31 = vpop.f32.mrb[1].mxu0 }
  0xd9   :  { %v107_v32 = vmax.f32 %v104_v30, 0.0 }
  0xdb   :  { %268 = vmatmul.mubr.f32.vlgmr.msra.gmra.mrb[0].mxu1 %v107_v32 }
 0x1ae   :  { %v197_v34 = vpop.f32.mrb[0].mxu1 }
 0x1af   :  { %v198_v35 = vadd.f32 %v210_v33, %v197_v34  ;;  %v269_v36 = vpop.f32.mrb[1].mxu1 }
 0x1b1   :  { %202 = vst.msk [vmem:[%s398_s5] sm:$0xff] %vm201_vm3, %v198_v35 }

// kernel: net_forward.1
= control target key start
LH: loop header
LB: loop body
LE: loop exit
PB: predicated region body
PF: predicated region fallthrough
CT: control target
= control target key end

     0   :  { %vm33_vm0 = vcmask 1043456   ;;  %vm29_vm1 = vcmask 31744   ;;  %v297_v0 = vmov 0.0   ;;  %vm298_vm2 = vmmov 0   ;;  %s393_s1 = inlined_call_operand.vmem [shape: f32[4,128], index: 1, kind: input, shape index: {}]   ;;  %s394_s0 = inlined_call_operand.vmem [shape: f32[8,4], index: 0, kind: input, shape index: {}]   ;;  %s395_s3 = inlined_call_operand.vmem [shape: f32[128,2], index: 3, kind: input, shape index: {}]   ;;  %s396_s2 = inlined_call_operand.vmem [shape: f32[1,128], index: 2, kind: input, shape index: {}]   ;;  %s397_s4 = inlined_call_operand.vmem [shape: f32[1,2], index: 4, kind: input, shape index: {}]   ;;  %s398_s5 = inlined_call_operand.vmem [shape: f32[8,2], index: 5, kind: output, shape index: {}]  }
   0x1   :  { %230 = vmatprep.subr.mxu0 %v297_v0  ;;  %v21_v1 = vld [vmem:[%s393_s1] sm:$0xf]  ;;  %232 = vmatprep.mubr.msk.f32.mxu0 %vm298_vm2, %v297_v0  ;;  %v299_v4 = vmov 0.0|0.0   ;;  %v109_v5 = vld [vmem:[%s395_s3 + $0x8] sm:$0xff]  ;;  %v110_v6 = vld [vmem:[%s395_s3 + $0x10] sm:$0xff]  ;;  %vm201_vm3 = vcmask 15360  }
   0x2   :  { %v20_v2 = vld [vmem:[%s394_s0] sm:$0xff]  ;;  %231 = vmatpush3.msk.msra.mxu0 %vm33_vm0, %v21_v1  ;;  %270 = vmatprep.subr.bf16.mxu1 %v299_v4  ;;  %v111_v7 = vld [vmem:[%s395_s3 + $0x18] sm:$0xff]  ;;  %v113_v11 = vld [vmem:[%s395_s3 + $0x28] sm:$0xff] }
   0x3   :  { %v108_v3 = vld [vmem:[%s395_s3] sm:$0xff]  ;;  %233 = vmatmul.mubr.msk.f32.vlgmr.msra.gmra.mrb[0].mxu0 %vm29_vm1, %v20_v2  ;;  %267 = vmatprep.mubr.msk.f32.mxu1 %vm298_vm2, %v297_v0  ;;  %v274_v9 = vpack.c.bf16 %v111_v7, %v110_v6  ;;  %v114_v13 = vld [vmem:[%s395_s3 + $0x30] sm:$0xff]  ;;  %v115_v14 = vld [vmem:[%s395_s3 + $0x38] sm:$0xff] }
   0x4   :  { %v271_v8 = vpack.c.bf16 %v109_v5, %v108_v3  ;;  %v112_v10 = vld [vmem:[%s395_s3 + $0x20] sm:$0xff]  ;;  %v280_v15 = vpack.c.bf16 %v115_v14, %v114_v13  ;;  %v117_v17 = vld [vmem:[%s395_s3 + $0x48] sm:$0xff]  ;;  %v118_v19 = vld [vmem:[%s395_s3 + $0x50] sm:$0xff] }
   0x5   :  { %v277_v12 = vpack.c.bf16 %v113_v11, %v112_v10  ;;  %v116_v16 = vld [vmem:[%s395_s3 + $0x40] sm:$0xff]  ;;  %v119_v20 = vld [vmem:[%s395_s3 + $0x58] sm:$0xff]  ;;  %v121_v23 = vld [vmem:[%s395_s3 + $0x68] sm:$0xff] }
   0x6   :  { %272 = vmatpush3.bf16.msra.mxu1 %v271_v8  ;;  %v283_v18 = vpack.c.bf16 %v117_v17, %v116_v16  ;;  %v286_v21 = vpack.c.bf16 %v119_v20, %v118_v19  ;;  %v120_v22 = vld [vmem:[%s395_s3 + $0x60] sm:$0xff]  ;;  %v122_v25 = vld [vmem:[%s395_s3 + $0x70] sm:$0xff]  ;;  %v123_v26 = vld [vmem:[%s395_s3 + $0x78] sm:$0xff] }
   0x7   :  { %273 = vmatprep.subr.bf16.mxu1 %v299_v4  ;;  %v289_v24 = vpack.c.bf16 %v121_v23, %v120_v22  ;;  %v292_v27 = vpack.c.bf16 %v123_v26, %v122_v25  ;;  %v207_v28 = vld [vmem:[%s396_s2] ss:$0 sm:$0xff] }
   0x8   :  { %v210_v33 = vld [vmem:[%s397_s4] ss:$0 sm:$0xff] }
   0xa   :  { %275 = vmatpush3.bf16.msra.mxu1 %v274_v9 }
   0xb   :  { %276 = vmatprep.subr.bf16.mxu1 %v299_v4 }
   0xe   :  { %278 = vmatpush3.bf16.msra.mxu1 %v277_v12 }
   0xf   :  { %279 = vmatprep.subr.bf16.mxu1 %v299_v4 }
  0x12   :  { %281 = vmatpush3.bf16.msra.mxu1 %v280_v15 }
  0x13   :  { %282 = vmatprep.subr.bf16.mxu1 %v299_v4 }
  0x16   :  { %284 = vmatpush3.bf16.msra.mxu1 %v283_v18 }
  0x17   :  { %285 = vmatprep.subr.bf16.mxu1 %v299_v4 }
  0x1a   :  { %287 = vmatpush3.bf16.msra.mxu1 %v286_v21 }
  0x1b   :  { %288 = vmatprep.subr.bf16.mxu1 %v299_v4 }
  0x1e   :  { %290 = vmatpush3.bf16.msra.mxu1 %v289_v24 }
  0x1f   :  { %291 = vmatprep.subr.bf16.mxu1 %v299_v4 }
  0x22   :  { %293 = vmatpush3.bf16.msra.mxu1 %v292_v27 }
  0xd6   :  { %v103_v29 = vpop.f32.mrb[0].mxu0 }
  0xd7   :  { %v104_v30 = vadd.f32 %v207_v28, %v103_v29  ;;  %v234_v31 = vpop.f32.mrb[1].mxu0 }
  0xd9   :  { %v107_v32 = vmax.f32 %v104_v30, 0.0 }
  0xdb   :  { %268 = vmatmul.mubr.f32.vlgmr.msra.gmra.mrb[0].mxu1 %v107_v32 }
 0x1ae   :  { %v197_v34 = vpop.f32.mrb[0].mxu1 }
 0x1af   :  { %v198_v35 = vadd.f32 %v210_v33, %v197_v34  ;;  %v269_v36 = vpop.f32.mrb[1].mxu1 }
 0x1b1   :  { %202 = vst.msk [vmem:[%s398_s5] sm:$0xff] %vm201_vm3, %v198_v35 }

</bundles_post_ra>
